<compile_context>
chip_gen: v7x
topology: tpu7x:2x2x1
jax: 0.10.0
libtpu: 0.0.40
codegen_flags: <defaults>
</compile_context>

<pallas_src>
import jax
import jax.numpy as jnp
from jax.experimental import pallas as pl
from jax.experimental.pallas import tpu as pltpu


def _round_up(x, m):
    return (x + m - 1) // m * m


def _cdiv(a, b):
    return (a + b - 1) // b


def _vmem_capacity_bytes():
    """Per-core VMEM capacity; conservative fallback (v7x = 64 MiB) on failure."""
    try:
        info = pltpu.get_tpu_info()
        cap = getattr(info, "vmem_capacity_bytes", None)
        if cap:
            return int(cap)
    except Exception:
        pass
    return 64 * 1024 * 1024


def _choose_tm(M, tm_max):
    """Largest MXU-friendly row tile <= min(tm_max, M).

    Prefers 128-aligned tiles, and shrinks (to a multiple of 8) when that
    would leave a single grid step, so the 'parallel' axis has >= 2 blocks to
    shard across both TensorCores on dual-TC chips (v7x)."""
    tm = min(tm_max, M)
    if tm >= 128:
        tm = (tm // 128) * 128
    if _cdiv(M, tm) < 2:
        cand = _round_up(_cdiv(M, 2), 8)
        if cand < M:          # multiple of 8 by construction -> legal block dim
            tm = cand
    return max(tm, 1)


def _patch_proj_kernel(a_ref, w_ref, b_ref, o_ref):
    # a_ref: (tm, K) compute_dtype   w_ref: (K, Ew) compute_dtype (resident)
    # b_ref: (1, Ew) f32             o_ref: (tm, Ew) out dtype
    acc = jnp.dot(a_ref[...], w_ref[...], preferred_element_type=jnp.float32)
    o_ref[...] = (acc + b_ref[...]).astype(o_ref.dtype)


def patch_embed(x, weight, bias, patch_size, *, compute_dtype=jnp.bfloat16,
                out_dtype=None, tm_max=1024):
    """ViT patch embedding.

    x: (B, C, H, W) NCHW (PyTorch layout). weight: (E, C, p, p) Conv2d weight.
    bias: (E,). Returns (B, n_patches, E).

    compute_dtype: MXU input dtype (default bfloat16 with f32 accumulation;
      this is lower precision than PyTorch's f32 Conv2d — pass jnp.float32 for
      closer parity at ~2x HBM cost).
    out_dtype: output dtype (default x.dtype; pass jnp.bfloat16 to halve the
      dominant output HBM stream if downstream tolerates it).
    """
    B, C, H, W = x.shape
    E = weight.shape[0]
    p = patch_size
    Hp, Wp = H // p, W // p
    n_patches = Hp * Wp
    K = C * p * p
    M = B * n_patches
    out_dtype = x.dtype if out_dtype is None else out_dtype

    # Cast to the narrow compute dtype BEFORE the rearrangement so the fused
    # XLA cast+transpose copy moves half the bytes.
    xc = x.astype(compute_dtype)
    wc = weight.astype(compute_dtype)

    # Patch gather (pure JAX glue, one fused copy):
    # (B,C,Hp,p,Wp,p) -> (B,Hp,Wp,C,p,p) -> (M, K); K ordered as (C,p,p) to
    # match the Conv2d OIHW weight flattening.
    A = jnp.transpose(xc.reshape(B, C, Hp, p, Wp, p), (0, 2, 4, 1, 3, 5)).reshape(M, K)
    Wt = wc.reshape(E, K).T                                   # (K, E)

    # E padding only when ragged (keeps lane-dense stores). K is never padded
    # (full-extent block), M is never padded (ragged cdiv grid).
    Ew = E if E % 128 == 0 else _round_up(E, 128)
    if Ew != E:
        Wt = jnp.pad(Wt, ((0, 0), (0, Ew - E)))
        b2 = jnp.pad(bias.astype(jnp.float32).reshape(1, E), ((0, 0), (0, Ew - E)))
    else:
        b2 = bias.astype(jnp.float32).reshape(1, E)

    # Tile sizing against the per-generation VMEM capacity (with headroom:
    # ~112 MiB on 128 MiB chips, ~56 MiB on v7x's 64 MiB).
    vmem_cap = (_vmem_capacity_bytes() * 7) // 8
    cd_sz = jnp.dtype(compute_dtype).itemsize
    out_sz = jnp.dtype(out_dtype).itemsize
    resident = 2 * K * Ew * cd_sz + 2 * 8 * Ew * 4            # weight + bias buffers
    per_row = 2 * (K * cd_sz + Ew * out_sz)                   # dbl-buffered A + out rows
    tm_budget = max(128, ((vmem_cap - resident - (4 << 20)) // per_row // 128) * 128)
    tm = _choose_tm(M, min(tm_max, tm_budget))
    grid = _cdiv(M, tm)

    out = pl.pallas_call(
        _patch_proj_kernel,
        out_shape=jax.ShapeDtypeStruct((M, Ew), out_dtype),
        grid_spec=pltpu.PrefetchScalarGridSpec(
            num_scalar_prefetch=0,
            grid=(grid,),
            in_specs=[
                pl.BlockSpec((tm, K), lambda i: (i, 0)),    # patch-row tile
                pl.BlockSpec((K, Ew), lambda i: (0, 0)),    # weight (constant idx -> resident)
                pl.BlockSpec((1, Ew), lambda i: (0, 0)),    # bias
            ],
            out_specs=pl.BlockSpec((tm, Ew), lambda i: (i, 0)),
        ),
        compiler_params=pltpu.CompilerParams(
            dimension_semantics=("parallel",),
            vmem_limit_bytes=int(vmem_cap),
        ),
    )(A, Wt, b2)

    if Ew != E:
        out = out[:, :E]
    return out.reshape(B, n_patches, E)


if __name__ == "__main__":
    def reference(x, weight, bias, p, compute_dtype):
        # Reference on compute_dtype-rounded inputs (f32 math), numerically
        # comparable to the bf16-MXU / f32-accumulation kernel path.
        xb = x.astype(compute_dtype).astype(jnp.float32)
        wb = weight.astype(compute_dtype).astype(jnp.float32)
        r = jax.lax.conv_general_dilated(
            xb, wb, window_strides=(p, p), padding="VALID",
            dimension_numbers=("NCHW", "OIHW", "NCHW"))
        r = r + bias.astype(jnp.float32).reshape(1, -1, 1, 1)
        return r.reshape(r.shape[0], r.shape[1], -1).transpose(0, 2, 1)

    key = jax.random.PRNGKey(0)

    # Config 1: module defaults (small) — exercises ragged E (96->128 pad),
    #   tiny full-extent K (=16), and the grid>=2 split (M=128 -> tm=64).
    # Config 2: ViT-like dims — exercises aligned K/E (=768) with ragged M
    #   (144, cdiv grid, no padding, no post-kernel slice).
    configs = [
        dict(batch=2, in_chan=4, img=16, p=2, E=96),
        dict(batch=4, in_chan=3, img=96, p=16, E=768),
    ]

    for cfg in configs:
        kx, kw, kb, key = jax.random.split(key, 4)
        x = jax.random.normal(
            kx, (cfg["batch"], cfg["in_chan"], cfg["img"], cfg["img"]), dtype=jnp.float32)
        weight = jax.random.normal(
            kw, (cfg["E"], cfg["in_chan"], cfg["p"], cfg["p"]), dtype=jnp.float32) * 0.02
        bias = jax.random.normal(kb, (cfg["E"],), dtype=jnp.float32) * 0.02

        out = patch_embed(x, weight, bias, cfg["p"])
        out = jax.block_until_ready(out)

        n_patches = (cfg["img"] // cfg["p"]) ** 2
        assert out.shape == (cfg["batch"], n_patches, cfg["E"]), out.shape

        ref = reference(x, weight, bias, cfg["p"], jnp.bfloat16)
        max_err = float(jnp.abs(out - ref).max())
        assert jnp.allclose(out, ref, atol=3e-3, rtol=3e-3), (cfg, max_err)

    print("KERNEL_OK")
</pallas_src>

<mosaic_0001>
module attributes {stable_mosaic.version = 11 : i64} {
  func.func @_patch_proj_kernel(%arg0: i32, %arg1: memref<64x16xbf16, #tpu.memory_space<vmem>>, %arg2: memref<16x128xbf16, #tpu.memory_space<vmem>>, %arg3: memref<1x128xf32, #tpu.memory_space<vmem>>, %arg4: memref<64x128xf32, #tpu.memory_space<vmem>>) attributes {dimension_semantics = [#tpu.dimension_semantics<parallel>], iteration_bounds = array<i64: 2>, scalar_prefetch = 0 : i64, scratch_operands = 0 : i64, tpu.core_type = #tpu.core_type<tc>, window_params = [{transform_indices = @transform_0, window_bounds = array<i64: 64, 16>}, {pipeline_mode = #tpu.pipeline_mode<synchronous>, transform_indices = @transform_1, window_bounds = array<i64: 16, 128>}, {pipeline_mode = #tpu.pipeline_mode<synchronous>, transform_indices = @transform_2, window_bounds = array<i64: 1, 128>}, {transform_indices = @transform_3, window_bounds = array<i64: 64, 128>}]} {
    %c0 = arith.constant 0 : index
    %c0_0 = arith.constant 0 : index
    %0 = vector.load %arg1[%c0, %c0_0] : memref<64x16xbf16, #tpu.memory_space<vmem>>, vector<64x16xbf16>
    %c0_1 = arith.constant 0 : index
    %c0_2 = arith.constant 0 : index
    %1 = vector.load %arg2[%c0_1, %c0_2] : memref<16x128xbf16, #tpu.memory_space<vmem>>, vector<16x128xbf16>
    %cst = arith.constant dense<0.000000e+00> : vector<64x128xf32>
    %2 = tpu.matmul %0, %1, %cst {dimension_numbers = #tpu.dot_dimension_numbers<[1], [0], [0], [1], [0, 0, 1, 1], [], []>} : vector<64x16xbf16>, vector<16x128xbf16>, vector<64x128xf32> -> vector<64x128xf32>
    %c0_3 = arith.constant 0 : index
    %c0_4 = arith.constant 0 : index
    %3 = vector.load %arg3[%c0_3, %c0_4] : memref<1x128xf32, #tpu.memory_space<vmem>>, vector<1x128xf32>
    %4 = vector.broadcast %3 : vector<1x128xf32> to vector<64x128xf32>
    %5 = arith.addf %2, %4 : vector<64x128xf32>
    %c0_5 = arith.constant 0 : index
    %c0_6 = arith.constant 0 : index
    %6 = vector.load %arg4[%c0_5, %c0_6] : memref<64x128xf32, #tpu.memory_space<vmem>>, vector<64x128xf32>
    tpu.vector_store %arg4[%c0_5, %c0_6], %5 {strides = array<i32>} : memref<64x128xf32, #tpu.memory_space<vmem>>, vector<64x128xf32>,
    return
  }
  func.func @transform_0(%arg0: i32) -> (i32, i32) {
    %c0_i32 = arith.constant 0 : i32
    %c0_i32_0 = arith.constant 0 : i32
    return %arg0, %c0_i32 : i32, i32
  }
  func.func @transform_1(%arg0: i32) -> (i32, i32) {
    %c0_i32 = arith.constant 0 : i32
    %c0_i32_0 = arith.constant 0 : i32
    %c0_i32_1 = arith.constant 0 : i32
    return %c0_i32, %c0_i32_0 : i32, i32
  }
  func.func @transform_2(%arg0: i32) -> (i32, i32) {
    %c0_i32 = arith.constant 0 : i32
    %c0_i32_0 = arith.constant 0 : i32
    %c0_i32_1 = arith.constant 0 : i32
    return %c0_i32, %c0_i32_0 : i32, i32
  }
  func.func @transform_3(%arg0: i32) -> (i32, i32) {
    %c0_i32 = arith.constant 0 : i32
    %c0_i32_0 = arith.constant 0 : i32
    return %arg0, %c0_i32 : i32, i32
  }
}

</mosaic_0001>

<bundles_post_ra>
// kernel: tpu_custom_call.1
= control target key start
LH: loop header
LB: loop body
LE: loop exit
PB: predicated region body
PF: predicated region fallthrough
CT: control target
= control target key end

     0   :  { %8 = vsyncpa [#allocation3], 0  ;;  %s663_s0 = inlined_call_operand.vmem [shape: bf16[128,16], index: 0, kind: input, shape index: {}]   ;;  %s664_s1 = inlined_call_operand.vmem [shape: bf16[16,128], index: 1, kind: input, shape index: {}]   ;;  %s665_s2 = inlined_call_operand.vmem [shape: f32[1,128], index: 2, kind: input, shape index: {}]   ;;  %s666_s3 = inlined_call_operand.hbm [shape: f32[128,128], index: 3, kind: output, shape index: {}]  }
   0x1   :  { %10 = vsyncpa [#allocation3 + $0x1], 0  ;;  %s551_s12 = smov 0   ;;  %s553_s13 = smov 0  }
   0x2   :  { %s555_s14 = smov 0   ;;  %s557_s15 = smov 0  }
   0x3 LB: > { %s572_s16 = sadd.s32 4294967295, %s526_s15   ;;  %s378_s17 = sadd.s32 4294967294, %s526_s15   ;;  %s526_s15 = sphi %s557_s15, %s672_s15   ;;  %s522_s14 = sphi %s555_s14, %s671_s14   ;;  %s518_s13 = sphi %s553_s13, %s670_s13   ;;  %s514_s12 = sphi %s551_s12, %s669_s12  }
   0x4   : > { %s576_s18 = sadd.s32 1, %s526_s15   ;;  %s91_s19 = sadd.s32 1, %s522_s14 }
   0x5   : > { %s88_s20 = ssub.s32 %s526_s15, %s576_s18  ;;  %p101_p0 = scmp.ne.s32.totalorder %s522_s14, %s518_s13 }
   0x6   : > { %p89_p1 = scmp.eq.s32.totalorder %s88_s20, 0  ;;  %p102_p2 = scmp.eq.s32.totalorder %s572_s16, 1 }
   0x7   : > { %p107_p3 = scmp.ne.s32.totalorder %s518_s13, %s514_s12  ;;  %p108_p4 = scmp.eq.s32.totalorder %s378_s17, 1 }
   0x8   : > { %s587_s21 = scalar_select %p89_p1, %s522_s14, %s91_s19  }
   0x9   : > { %p589_p5 = por %p102_p2, %p101_p0  ;;  %p593_p6 = por %p108_p4, %p107_p3 }
   0xa   : > { %p381_p7 = scmp.ge.s32.totalorder %s526_s15, 1  ;;  %p141_p8 = scmp.lt.s32.totalorder %s526_s15, 3 }
   0xc   : > { %p142_p9 = pnand %p381_p7, %p141_p8 }
   0xd   : > { %v459_v0 = vld [vmem:[%s664_s1] sm:$0xff] (!%p142_p9)   ;;  %s383_s26 = sshll.u32 (!%p142_p9), %s572_s16, 3  ;;  %vm216_vm0 = vcmask (!%p142_p9), 130048   ;;  %s162_s4 = sand.u32 (!%p142_p9), 1, %s518_s13  }
   0xe   : > { %145 = sbr.rel (%p142_p9) target bundleno = 258 (0x102), region = 32  ;;  %p166_p10 = scmp.lt.s32.totalorder (!%p142_p9), %s383_s26, 15  ;;  %406 = vmatprep.subr.bf16.mxu0 (!%p142_p9), %v459_v0  ;;  %416 = vmatprep.subr.bf16.mxu1 (!%p142_p9), %v459_v0  ;;  %v385_v5 = vld [vmem:[%s665_s2] ss:$0 sm:$0xff] (!%p142_p9) }
   0xf   : > { %407 = vmatpush3.bf16.msra.mxu0 (!%p142_p9), %v459_v0  ;;  %417 = vmatpush3.bf16.msra.mxu1 (!%p142_p9), %v459_v0  ;;  %s382_s5 = sshll.u32 (!%p142_p9), %s162_s4, 6  ;;  %s400_s8 = sshll.u32 (!%p142_p9), %s572_s16, 10 }
  0x10   : > { %s164_s9 = scalar_lea.vmem (!%p142_p9), [#allocation2], %s382_s5  ;;  %s616_s17 = scalar_lea.hbm (!%p142_p9), %s666_s3, %s400_s8 }
  0x11   : > { %s316_s10 = sshll.u32 (!%p142_p9), %s164_s9, 4  ;;  %s622_s19 = scalar_lea.sflag (!%p142_p9), [#allocation3], %s162_s4  ;;  %s618_s10 = int_to_ptr.vmem [resolvable:$true] %s316_s10 }
  0x12   : > { %s464_s20 = scalar_lea.vmem (!%p142_p9), %s618_s10, 1024  ;;  %s528_s24 = smov (!%p142_p9), [#allocation2]  }
  0x13   : > { %p465_p11 = scmp.ne.s32.totalorder (!%p142_p9), %s618_s10, %s464_s20  ;;  %s468_s25 = sshll.u32 (!%p142_p9), %s528_s24, 4  ;;  %s469_s25 = int_to_ptr.vmem [resolvable:$false] %s468_s25 }
  0x14   : > { %p471_p0 = scmp.lt.s32.totalorder (!%p142_p9), %s618_s10, %s469_s25 }
  0x15   : > { %s674_s26 = smov (!%p166_p10, %s383_s26), 15  ;;  %p466_p12 = pnand %p465_p11, %p589_p5 }
  0x16   : > { %s384_s27 = sshll.u32 %s674_s26, 2  ;;  %s470_s26 = scalar_lea.vmem %s469_s25, 2048 }
  0x17   : > { %s169_s30 = scalar_lea.vmem %s663_s0, %s384_s27  ;;  %p467_p13 = pneg %p466_p12 }
  0x18   : > { %v460_v1 = vld [vmem:[%s169_s30] sm:$0xff]   ;;  %v461_v2 = vld [vmem:[%s169_s30 + $0x10] sm:$0xff]   ;;  %v462_v3 = vld [vmem:[%s169_s30 + $0x8] sm:$0xff]   ;;  %p472_p1 = scmp.lt.s32.totalorder %s470_s26, %s464_s20 }
  0x19   : > { %408 = vmatprep.mubr.msk.bf16.mxu0 %vm216_vm0, %v460_v1  ;;  %412 = vmatprep.mubr.msk.bf16.mxu1 %vm216_vm0, %v461_v2  ;;  %v463_v4 = vld [vmem:[%s169_s30 + $0x18] sm:$0xff]  }
  0x1a   : > { %409 = vmatmul.mubr.msk.bf16.vlgmr.msra.gmra.mrb[0].mxu0 %vm216_vm0, %v462_v3  ;;  %413 = vmatmul.mubr.msk.bf16.vlgmr.msra.gmra.mrb[0].mxu1 %vm216_vm0, %v463_v4  ;;  %p473_p2 = por %p472_p1, %p471_p0 }
  0x1c   : > { %p474_p3 = pnand %p473_p2, %p467_p13 }
  0xed   : > { %v410_v6 = vpop.f32.mrb[0].mxu0  ;;  %v414_v8 = vpop.f32.mrb[0].mxu1 }
  0xee   : > { %v272_v7 = vadd.f32 %v410_v6, %v385_v5  ;;  %v263_v9 = vpop.f32.mrb[1].mxu0  ;;  %v288_v10 = vadd.f32 %v414_v8, %v385_v5  ;;  %v279_v12 = vpop.f32.mrb[1].mxu1 }
  0xef   : > { %v264_v11 = vadd.f32 %v385_v5, %v263_v9  ;;  %v411_v13 = vpop.f32.mrb[2].mxu0  ;;  %v280_v14 = vadd.f32 %v385_v5, %v279_v12  ;;  %v415_v16 = vpop.f32.mrb[2].mxu1 }
  0xf0   : > { %296 = vst [vmem:[%s164_s9 + $0x10] sm:$0xff] %v272_v7  ;;  %v275_v15 = vadd.f32 %v411_v13, %v385_v5  ;;  %v266_v17 = vpop.f32.mrb[3].mxu0  ;;  %300 = vst [vmem:[%s164_s9 + $0x30] sm:$0xff] %v288_v10  ;;  %v291_v18 = vadd.f32 %v415_v16, %v385_v5  ;;  %v282_v20 = vpop.f32.mrb[3].mxu1 }
  0xf1   : > { %294 = vst [vmem:[%s164_s9] sm:$0xff] %v264_v11  ;;  %v267_v19 = vadd.f32 %v385_v5, %v266_v17  ;;  %298 = vst [vmem:[%s164_s9 + $0x20] sm:$0xff] %v280_v14  ;;  %v283_v21 = vadd.f32 %v385_v5, %v282_v20 }
  0xf2   : > { %297 = vst [vmem:[%s164_s9 + $0x18] sm:$0xff] %v275_v15  ;;  %301 = vst [vmem:[%s164_s9 + $0x38] sm:$0xff] %v291_v18 }
  0xf3   : > { %295 = vst [vmem:[%s164_s9 + $0x8] sm:$0xff] %v267_v19  ;;  %299 = vst [vmem:[%s164_s9 + $0x28] sm:$0xff] %v283_v21 }
  0xf4   : > { %477 = shalt.err (!%p474_p3)
}
  0xf5   : > { %s478_s27 = scalar_lea.hbm %s616_s17, 1024  ;;  %s482_s30 = scalar_lea.hbm %s666_s3, 2048 }
  0xf6   : > { %p479_p4 = scmp.ne.s32.totalorder %s616_s17, %s478_s27  ;;  %p483_p9 = scmp.lt.u32.totalorder %s616_s17, %s666_s3 }
  0xf7   : > { %p484_p10 = scmp.lt.u32.totalorder %s482_s30, %s478_s27  ;;  %p486_p12 = scmp.lt.u32.totalorder %s478_s27, %s616_s17 }
  0xf8   : > { %p480_p7 = pnand %p479_p4, %p589_p5 }
  0xf9   : > { %p485_p11 = por %p484_p10, %p483_p9 }
  0xfa   : > { %p481_p8 = pneg %p480_p7 }
  0xfb   : > { %p487_p13 = por %p486_p12, %p485_p11 }
  0xfd   : > { %p488_p0 = pnand %p487_p13, %p481_p8 }
  0xff   : > { %491 = shalt.err (!%p488_p0)
}
 0x100   : > { %s529_s6 = smov 128   ;;  %s530_s7 = smov 8  }
 0x101   : > { %418 = dma.vmem_to_hbm [thread:$0]  (%p589_p5), %s618_s10, 1024, %s616_s17, %s622_s19, %s529_s6, %s529_s6, %s530_s7  }
 0x102 PF: > { %p424_p1 = scmp.ge.s32.totalorder %s526_s15, 2  ;;  %s331_s8 = sand.u32 1, %s514_s12  }
 0x103   : > { %s332_s9 = scalar_lea.sflag [#allocation3], %s331_s8 }
 0x104   : > { %p421_p2 = pnand %p424_p1, %p593_p6 }
 0x106   : > { %509 = dma.done.wait (!%p421_p2), %s332_s9, 1024  }
 0x107   : > { %511 = vsyncadd (!%p421_p2), %s332_s9, 4294966272  ;;  %p13_p3 = scmp.ge.s32.totalorder %s576_s18, 4   ;;  %s669_s12 = smov %s518_s13 }
 0x108   : > { %s670_s13 = smov %s522_s14  ;;  %s671_s14 = smov %s587_s21 }
 0x109   : > { %s672_s15 = smov %s576_s18  ;;  %15 = sbr.rel (!%p13_p3) target bundleno = 3 (0x3), region = 67 }
 0x110   :  { %337 = vsyncpa [#allocation3], 1 }
 0x111   :  { %339 = vsyncpa [#allocation3 + $0x1], 1 }

</bundles_post_ra>
